<compile_context>
chip_gen: v7x
topology: tpu7x:2x2x1
jax: 0.10.0
libtpu: 0.0.40
codegen_flags: <defaults>
</compile_context>

<pallas_src>
import functools

import jax
import jax.numpy as jnp
from jax.experimental import pallas as pl
from jax.experimental.pallas import tpu as pltpu


_CONTRACT_LAST = (((1,), (1,)), ((), ()))   # contract dim 1 of lhs with dim 1 of rhs


def _row_sums_lane_major(values, c):
    """Sum `values` (tb, C) over C, returning a lane-major (1, tb) row.

    Implemented as ones(8, C) @ values.T on the MXU (the standard q @ k.T
    contraction pattern) so the per-row sums come out along the lane axis and
    the output store is dense. HIGHEST precision keeps full f32 accuracy.
    """
    ones = jnp.ones((8, c), jnp.float32)
    s8 = jax.lax.dot_general(
        ones, values, _CONTRACT_LAST,
        precision=jax.lax.Precision.HIGHEST,
        preferred_element_type=jnp.float32)        # (8, tb), rows identical
    return s8[0:1, :]                              # (1, tb)


def _entropy_softmax_kernel(x_ref, o_ref):
    # x_ref: (tb, C) logits tile; o_ref: (1, tb) lane-dense entropy tile.
    x = x_ref[...].astype(jnp.float32)             # upcast per-tile only
    c = x.shape[1]
    m = jnp.max(x, axis=1, keepdims=True)          # row max for stability
    s = x - m
    e = jnp.exp(s)                                 # EUP: the compute floor
    z = _row_sums_lane_major(e, c)                 # (1, tb) = sum(exp)
    t = _row_sums_lane_major(e * s, c)             # (1, tb) = sum(exp * shifted)
    # -(p * logp).sum(1) = log(z) - sum(e*s)/z   with p = e/z, logp = s - log(z)
    o_ref[...] = (jnp.log(z) - t / z).astype(o_ref.dtype)


def _entropy_plain_kernel(x_ref, o_ref):
    # applySoftMax=False branch: -(x * log2(x)).sum(dim=1)
    # (x == 0 yields NaN, matching the PyTorch reference semantics).
    x = x_ref[...].astype(jnp.float32)
    c = x.shape[1]
    t = _row_sums_lane_major(x * jnp.log2(x), c)   # (1, tb)
    o_ref[...] = (-t).astype(o_ref.dtype)


def _round_up(n, m):
    return (n + m - 1) // m * m


def _pick_batch_tile(B, C):
    """Choose (tb, padded_B).

    Budget: ~6 live f32 copies of a (tb, C) tile (double-buffered input plus
    elementwise temporaries) must fit the scoped VMEM limit on all generations,
    so cap the tile at ~1M elements (~4 MiB f32 per live copy) and 1024 rows.
    """
    max_tile_elems = 1 << 20
    tb_cap = max(128, min(1024, (max_tile_elems // max(C, 1)) // 128 * 128))
    if B <= tb_cap:
        return B, B                                # single full-batch tile, no pad
    num_tiles = -(-B // tb_cap)                    # cdiv
    tb = _round_up(-(-B // num_tiles), 128)        # 128-aligned for lane-dense out
    return tb, _round_up(B, tb)


@functools.partial(jax.jit, static_argnames=("apply_softmax",))
def entropy_loss(x, apply_softmax=True):
    """Pallas implementation of EntropyLoss.forward. x: (B, C) -> (B,) float32."""
    B, C = x.shape
    tb, b_pad = _pick_batch_tile(B, C)
    # TODO(synk): vocab-scale C (>~16K in f32) needs a C-tiled online-softmax
    # accumulator variant; a single (tb, C) row block no longer fits v7x VMEM.

    if b_pad != B:
        # Pad value 1.0 gives finite entropy in both branches; rows are dropped below.
        x = jnp.pad(x, ((0, b_pad - B), (0, 0)), constant_values=1.0)

    kernel = _entropy_softmax_kernel if apply_softmax else _entropy_plain_kernel

    # Keep compute in f32 inside the kernel (v5e has no bf16 VPU/EUP path); the
    # input stays in its own dtype for the HBM->VMEM DMA and is upcast per-tile.
    itemsize = jnp.dtype(x.dtype).itemsize
    vmem_need = tb * C * (2 * itemsize + 4 * 4) + (2 << 20)
    vmem_limit = int(min(max(vmem_need, 32 << 20), 56 << 20))  # stay under v7x 64 MiB

    out = pl.pallas_call(
        kernel,
        out_shape=jax.ShapeDtypeStruct((1, b_pad), jnp.float32),
        grid_spec=pltpu.PrefetchScalarGridSpec(
            num_scalar_prefetch=0,
            grid=(b_pad // tb,),
            in_specs=[pl.BlockSpec((tb, C), lambda i: (i, 0))],
            out_specs=pl.BlockSpec((1, tb), lambda i: (0, i)),
        ),
        compiler_params=pltpu.CompilerParams(
            dimension_semantics=("parallel",),      # batch tiles independent (v7x 2 TCs)
            vmem_limit_bytes=vmem_limit,
        ),
    )(x)
    return out[0, :B]


def _reference_entropy(x, apply_softmax=True):
    x = x.astype(jnp.float32)
    if apply_softmax:
        p = jax.nn.softmax(x, axis=1)
        logp = jax.nn.log_softmax(x, axis=1)
        e = p * logp
    else:
        e = x * jnp.log2(x)
    return -jnp.sum(e, axis=1)


if __name__ == "__main__":
    key = jax.random.PRNGKey(0)

    # Small classifier-like shape: batch of 8 rows of 128 class logits.
    B, C = 8, 128
    x = jax.random.normal(key, (B, C), dtype=jnp.float32)

    out = entropy_loss(x, apply_softmax=True)
    jax.block_until_ready(out)
    ref = _reference_entropy(x, apply_softmax=True)
    assert out.shape == (B,)
    assert jnp.allclose(out, ref, atol=1e-4, rtol=1e-4), (out, ref)

    # applySoftMax=False branch on strictly positive inputs (probabilities).
    probs = jax.nn.softmax(x, axis=1)
    out2 = entropy_loss(probs, apply_softmax=False)
    jax.block_until_ready(out2)
    ref2 = _reference_entropy(probs, apply_softmax=False)
    assert jnp.allclose(out2, ref2, atol=1e-4, rtol=1e-4), (out2, ref2)

    # Exercise the multi-tile + batch-padding path (grid > 1, lane-dense blocks,
    # non-multiple-of-128 class count).
    B2, C2 = 1500, 96
    x2 = jax.random.normal(jax.random.PRNGKey(1), (B2, C2), dtype=jnp.float32)
    out3 = entropy_loss(x2, apply_softmax=True)
    jax.block_until_ready(out3)
    ref3 = _reference_entropy(x2, apply_softmax=True)
    assert out3.shape == (B2,)
    assert jnp.allclose(out3, ref3, atol=1e-4, rtol=1e-4), (out3, ref3)

    print("KERNEL_OK")
</pallas_src>

<mosaic_0001>
module attributes {stable_mosaic.version = 11 : i64} {
  func.func @_entropy_softmax_kernel(%arg0: i32, %arg1: memref<8x128xf32, #tpu.memory_space<vmem>>, %arg2: memref<1x8xf32, #tpu.memory_space<vmem>>) attributes {dimension_semantics = [#tpu.dimension_semantics<parallel>], iteration_bounds = array<i64: 1>, scalar_prefetch = 0 : i64, scratch_operands = 0 : i64, tpu.core_type = #tpu.core_type<tc>, window_params = [{transform_indices = @transform_0, window_bounds = array<i64: 8, 128>}, {transform_indices = @transform_1, window_bounds = array<i64: 1, 8>}]} {
    %c0 = arith.constant 0 : index
    %c0_0 = arith.constant 0 : index
    %0 = vector.load %arg1[%c0, %c0_0] : memref<8x128xf32, #tpu.memory_space<vmem>>, vector<8x128xf32>
    %cst = arith.constant dense<0xFF800000> : vector<8xf32>
    %1 = vector.multi_reduction <maximumf>, %0, %cst [1] : vector<8x128xf32> to vector<8xf32>
    %2 = vector.shape_cast %1 : vector<8xf32> to vector<8x1xf32>
    %3 = vector.broadcast %2 : vector<8x1xf32> to vector<8x128xf32>
    %4 = arith.subf %0, %3 : vector<8x128xf32>
    %5 = math.exp %4 : vector<8x128xf32>
    %cst_1 = arith.constant 1.000000e+00 : f32
    %6 = vector.broadcast %cst_1 : f32 to vector<8x128xf32>
    %cst_2 = arith.constant dense<0.000000e+00> : vector<8x8xf32>
    %7 = tpu.matmul %6, %5, %cst_2 {dimension_numbers = #tpu.dot_dimension_numbers<[1], [1], [0], [0], [0, 0, 1, 0], [], []>, precision = #tpu.contract_precision<fp32>} : vector<8x128xf32>, vector<8x128xf32>, vector<8x8xf32> -> vector<8x8xf32>
    %8 = vector.extract_strided_slice %7 {offsets = [0, 0], sizes = [1, 8], strides = [1, 1]} : vector<8x8xf32> to vector<1x8xf32>
    %9 = arith.mulf %5, %4 : vector<8x128xf32>
    %cst_3 = arith.constant 1.000000e+00 : f32
    %10 = vector.broadcast %cst_3 : f32 to vector<8x128xf32>
    %cst_4 = arith.constant dense<0.000000e+00> : vector<8x8xf32>
    %11 = tpu.matmul %10, %9, %cst_4 {dimension_numbers = #tpu.dot_dimension_numbers<[1], [1], [0], [0], [0, 0, 1, 0], [], []>, precision = #tpu.contract_precision<fp32>} : vector<8x128xf32>, vector<8x128xf32>, vector<8x8xf32> -> vector<8x8xf32>
    %12 = vector.extract_strided_slice %11 {offsets = [0, 0], sizes = [1, 8], strides = [1, 1]} : vector<8x8xf32> to vector<1x8xf32>
    %13 = math.log %8 : vector<1x8xf32>
    %14 = arith.divf %12, %8 : vector<1x8xf32>
    %15 = arith.subf %13, %14 : vector<1x8xf32>
    %c0_5 = arith.constant 0 : index
    %c0_6 = arith.constant 0 : index
    %16 = vector.load %arg2[%c0_5, %c0_6] : memref<1x8xf32, #tpu.memory_space<vmem>>, vector<1x8xf32>
    tpu.vector_store %arg2[%c0_5, %c0_6], %15 {strides = array<i32>} : memref<1x8xf32, #tpu.memory_space<vmem>>, vector<1x8xf32>,
    return
  }
  func.func @transform_0(%arg0: i32) -> (i32, i32) {
    %c0_i32 = arith.constant 0 : i32
    %c0_i32_0 = arith.constant 0 : i32
    return %arg0, %c0_i32 : i32, i32
  }
  func.func @transform_1(%arg0: i32) -> (i32, i32) {
    %c0_i32 = arith.constant 0 : i32
    %c0_i32_0 = arith.constant 0 : i32
    return %c0_i32, %arg0 : i32, i32
  }
}

</mosaic_0001>

<bundles_post_ra>
// kernel: entropy_loss.1
= control target key start
LH: loop header
LB: loop body
LE: loop exit
PB: predicated region body
PF: predicated region fallthrough
CT: control target
= control target key end

     0   :  { %6 = vsyncpa [#allocation3], 0  ;;  %s1160_s0 = inlined_call_operand.hbm [shape: f32[8,128], index: 0, kind: input, shape index: {}]   ;;  %s1161_s1 = inlined_call_operand.hbm [shape: f32[1,8], index: 1, kind: output, shape index: {}]  }
   0x1   :  { %7 = vsyncpa [#allocation4], 0  ;;  %s1079_s6 = smov [#allocation2]   ;;  %s1031_s10 = scalar_lea.hbm %s1160_s0, 128 }
   0x2   :  { %s14_s7 = sshll.u32 %s1079_s6, 4  ;;  %p1032_p0 = scmp.ne.s32.totalorder %s1160_s0, %s1031_s10  ;;  %s15_s7 = int_to_ptr.vmem [resolvable:$true] %s14_s7 }
   0x3   :  { %p1035_p1 = scmp.lt.u32.totalorder %s1031_s10, %s1160_s0 }
   0x5   :  { %p1037_p2 = pnand %p1035_p1, %p1032_p0 }
   0x7   :  { %1040 = shalt.err (!%p1037_p2)
}
   0x8   :  { %s1041_s15 = scalar_lea.vmem %s15_s7, 128  ;;  %p1046_p4 = scmp.lt.s32.totalorder %s15_s7, %s15_s7 }
   0x9   :  { %p1042_p3 = scmp.ne.s32.totalorder %s15_s7, %s1041_s15  ;;  %p1047_p5 = scmp.lt.s32.totalorder %s1041_s15, %s1041_s15 }
   0xb   :  { %p1048_p6 = por %p1047_p5, %p1046_p4 }
   0xd   :  { %p1049_p7 = pnand %p1048_p6, %p1042_p3 }
   0xf   :  { %1052 = shalt.err (!%p1049_p7)
}
  0x10   :  { %17 = dma.hbm_to_vmem [thread:$0]  %s1160_s0, 128, %s15_s7, [#allocation3]  }
  0x11   :  { %1075 = dma.done.wait [#allocation3], 128  }
  0x12   :  { %1076 = vsyncadd [#allocation3], 4294967168  ;;  %v21_v0 = vld [vmem:[#allocation2] sm:$0xff]  ;;  %v1080_v1 = vmov 0.0   ;;  %vm1081_vm0 = vmmov 0   ;;  %v1082_v17 = vmov 1.0  }
  0x13   :  { %22 = vmax.xlane.f32.xlu0 %v21_v0  ;;  %940 = vmatprep.subr.mxu0 %v1080_v1  ;;  %s1083_s0 = smov [#allocation5]   ;;  %vm899_vm1 = vcmask 57344  }
  0x14   :  { %970 = vmatprep.subr.mxu1 %v1080_v1  ;;  %942 = vmatprep.mubr.msk.f32.mxu0 %vm1081_vm0, %v1080_v1  ;;  %s907_s18 = sshll.u32 %s1083_s0, 4  ;;  %s908_s18 = int_to_ptr.vmem [resolvable:$true] %s907_s18 }
  0x15   :  { %972 = vmatprep.mubr.msk.f32.mxu1 %vm1081_vm0, %v1080_v1  ;;  %s1053_s19 = scalar_lea.vmem %s908_s18, 16  ;;  %s1057_s20 = scalar_lea.vmem %s908_s18, 32 }
  0x16   :  { %p1054_p8 = scmp.ne.s32.totalorder %s908_s18, %s1053_s19  ;;  %p1058_p9 = scmp.lt.s32.totalorder %s908_s18, %s908_s18 }
  0x17   :  { %p1059_p10 = scmp.lt.s32.totalorder %s1057_s20, %s1053_s19 }
  0x19   :  { %p1060_p11 = por %p1059_p10, %p1058_p9 }
  0x1b   :  { %p1061_p12 = pnand %p1060_p11, %p1054_p8 }
  0xa0   :  { %v23_v2 = vpop.xlane.xlu0 %22 }
  0xa1   :  { %v24_v3 = vsub.f32 %v21_v0, %v23_v2 }
  0xa3   :  { %v25_v4 = vmul.f32 1.442695, %v24_v3 }
  0xa5   :  { %1025 = vpow2.f32 %v25_v4 }
  0xaf   :  { %v1026_v5 = vpop.eup %1025 }
  0xb0   :  { %v460_v6 = vmul.f32 %v1026_v5, %v24_v3  ;;  %v28_v7 = vand.u32 4294901760, %v1026_v5 }
  0xb2   :  { %v462_v8 = vand.u32 4294901760, %v460_v6  ;;  %941 = vmatpush3.xpose.msra.mxu0 %v28_v7  ;;  %v100_v9 = vsub.f32 %v1026_v5, %v28_v7 }
  0xb3   :  { %945 = vmatprep.subr.mxu0 %v1080_v1 }
  0xb4   :  { %v534_v10 = vsub.f32 %v460_v6, %v462_v8  ;;  %971 = vmatpush3.xpose.msra.mxu1 %v462_v8  ;;  %v101_v11 = vand.u32 4294901760, %v100_v9 }
  0xb5   :  { %943 = vmatmul.mubr.f32.vlgmr.msra.gmra.mrb[0].mxu0 %v1080_v1  ;;  %975 = vmatprep.subr.mxu1 %v1080_v1 }
  0xb6   :  { %v535_v12 = vand.u32 4294901760, %v534_v10  ;;  %v102_v13 = vsub.f32 %v100_v9, %v101_v11  ;;  %947 = vmatprep.mubr.msk.f32.mxu0 %vm1081_vm0, %v1080_v1 }
  0xb7   :  { %973 = vmatmul.mubr.f32.vlgmr.msra.gmra.mrb[0].mxu1 %v1080_v1 }
  0xb8   :  { %v103_v14 = vand.u32 4294901760, %v102_v13  ;;  %v536_v15 = vsub.f32 %v534_v10, %v535_v12  ;;  %977 = vmatprep.mubr.msk.f32.mxu1 %vm1081_vm0, %v1080_v1 }
  0xba   :  { %946 = vmatpush3.xpose.msra.mxu0 %v103_v14  ;;  %v537_v16 = vand.u32 4294901760, %v536_v15 }
  0xbb   :  { %950 = vmatprep.subr.mxu0 %v1080_v1 }
  0xbc   :  { %976 = vmatpush3.xpose.msra.mxu1 %v537_v16 }
  0xbd   :  { %948 = vmatmul.mubr.f32.vlgmr.msra.gmra.mrb[0].mxu0 %v1082_v17  ;;  %980 = vmatprep.subr.mxu1 %v1080_v1 }
  0xbe   :  { %951 = vmatpush3.xpose.msra.mxu0 %v100_v9  ;;  %952 = vmatprep.mubr.msk.f32.mxu0 %vm1081_vm0, %v1080_v1 }
  0xbf   :  { %978 = vmatmul.mubr.f32.vlgmr.msra.gmra.mrb[0].mxu1 %v1082_v17  ;;  %955 = vmatprep.subr.mxu0 %v1080_v1 }
  0xc0   :  { %981 = vmatpush3.xpose.msra.mxu1 %v534_v10  ;;  %982 = vmatprep.mubr.msk.f32.mxu1 %vm1081_vm0, %v1080_v1 }
  0xc1   :  { %985 = vmatprep.subr.mxu1 %v1080_v1 }
  0xc5   :  { %953 = vmatmul.mubr.f32.vlgmr.msra.gmra.mrb[0].mxu0 %v1080_v1 }
  0xc6   :  { %956 = vmatpush3.xpose.msra.mxu0 %v28_v7  ;;  %957 = vmatprep.mubr.msk.f32.mxu0 %vm1081_vm0, %v1080_v1 }
  0xc7   :  { %983 = vmatmul.mubr.f32.vlgmr.msra.gmra.mrb[0].mxu1 %v1080_v1  ;;  %960 = vmatprep.subr.mxu0 %v1080_v1 }
  0xc8   :  { %986 = vmatpush3.xpose.msra.mxu1 %v462_v8  ;;  %987 = vmatprep.mubr.msk.f32.mxu1 %vm1081_vm0, %v1080_v1 }
  0xc9   :  { %990 = vmatprep.subr.mxu1 %v1080_v1 }
  0xcd   :  { %958 = vmatmul.mubr.f32.vlgmr.msra.gmra.mrb[0].mxu0 %v1080_v1 }
  0xce   :  { %961 = vmatpush3.xpose.msra.mxu0 %v101_v11  ;;  %962 = vmatprep.mubr.msk.f32.mxu0 %vm1081_vm0, %v1080_v1 }
  0xcf   :  { %988 = vmatmul.mubr.f32.vlgmr.msra.gmra.mrb[0].mxu1 %v1080_v1  ;;  %965 = vmatprep.subr.mxu0 %v1080_v1 }
  0xd0   :  { %991 = vmatpush3.xpose.msra.mxu1 %v535_v12  ;;  %992 = vmatprep.mubr.msk.f32.mxu1 %vm1081_vm0, %v1080_v1 }
  0xd1   :  { %995 = vmatprep.subr.mxu1 %v1080_v1 }
  0xd5   :  { %963 = vmatmul.mubr.f32.vlgmr.msra.gmra.mrb[0].mxu0 %v1082_v17 }
  0xd6   :  { %966 = vmatpush3.xpose.msra.mxu0 %v28_v7  ;;  %967 = vmatprep.mubr.msk.f32.mxu0 %vm1081_vm0, %v1080_v1 }
  0xd7   :  { %993 = vmatmul.mubr.f32.vlgmr.msra.gmra.mrb[0].mxu1 %v1082_v17 }
  0xd8   :  { %996 = vmatpush3.xpose.msra.mxu1 %v462_v8  ;;  %997 = vmatprep.mubr.msk.f32.mxu1 %vm1081_vm0, %v1080_v1 }
  0xdd   :  { %968 = vmatmul.mubr.f32.vlgmr.msra.gmra.mrb[0].mxu0 %v1082_v17 }
  0xdf   :  { %998 = vmatmul.mubr.f32.vlgmr.msra.gmra.mrb[0].mxu1 %v1082_v17 }
 0x1b0   :  { %v456_v18 = vpop.f32.mrb[0].mxu0 }
 0x1b1   :  { %1027 = vlog2.f32 %v456_v18  ;;  %v969_v19 = vpop.f32.mrb[1].mxu0 }
 0x1b2   :  { %1029 = vrcp.f32 %v456_v18  ;;  %v890_v20 = vpop.f32.mrb[0].mxu1 }
 0x1b3   :  { %v999_v21 = vpop.f32.mrb[1].mxu1 }
 0x1bb   :  { %v1028_v22 = vpop.eup %1027 }
 0x1bc   :  { %v1030_v23 = vpop.eup %1029  ;;  %v895_v24 = vmul.f32 0.6931472, %v1028_v22 }
 0x1bd   :  { %v897_v25 = vmul.f32 %v1030_v23, %v890_v20 }
 0x1bf   :  { %v898_v26 = vsub.f32 %v895_v24, %v897_v25 }
 0x1c1   :  { %900 = vst.msk [vmem:[#allocation5] sm:$0x1] %vm899_vm1, %v898_v26 }
 0x1c2   :  { %1064 = shalt.err (!%p1061_p12)
}
 0x1c3   :  { %s1065_s23 = scalar_lea.hbm %s1161_s1, 16 }
 0x1c4   :  { %p1066_p13 = scmp.ne.s32.totalorder %s1161_s1, %s1065_s23  ;;  %p1069_p0 = scmp.lt.u32.totalorder %s1065_s23, %s1161_s1 }
 0x1c6   :  { %p1071_p1 = pnand %p1069_p0, %p1066_p13 }
 0x1c8   :  { %1074 = shalt.err (!%p1071_p1)
}
 0x1c9   :  { %910 = dma.vmem_to_hbm [thread:$0]  %s908_s18, 16, %s1161_s1, [#allocation4]  }
 0x1ca   :  { %1077 = dma.done.wait [#allocation4], 16  }
 0x1cb   :  { %1078 = vsyncadd [#allocation4], 4294967280 }
 0x1cc   :  { %914 = vsyncpa [#allocation3], 1 }
 0x1cd   :  { %915 = vsyncpa [#allocation4], 1 }

</bundles_post_ra>
